<compile_context>
chip_gen: v5e
topology: v5e:2x2
jax: 0.10.0
libtpu: 0.0.40
codegen_flags: <defaults>
</compile_context>

<pallas_src>
import functools
import math

import jax
import jax.numpy as jnp
from jax import lax
from jax.experimental import pallas as pl
from jax.experimental.pallas import tpu as pltpu


def _round_up(n, m):
    return (n + m - 1) // m * m


def _divisors(n):
    return [d for d in range(1, n + 1) if n % d == 0]


# ----------------------------- Pallas kernel --------------------------------
def temporal_block_kernel(x_ref, w1_ref, b1_ref, w2_ref, b2_ref, *rest,
                          tt, K, dilation, pad, pad_r, n_time_tiles,
                          compute_dtype, use_res_matmul):
    """One (batch-tile, time-tile) program.  The time axis is sequential; the
    causal halos of x and of the conv1 activation h are carried across time
    tiles in VMEM scratch, so x is read from HBM exactly once and no conv1
    rows are recomputed.

    x_ref  : (tb, tt, C_in)      current time tile of x
    w1_ref : (K, C_in, C_pad)    conv1 weights, out-channels padded to C_pad
    b1_ref : (1, C_pad)          f32
    w2_ref : (K, C_pad, C_pad)   conv2 weights
    b2_ref : (1, C_pad)          f32
    [wr_ref: (C_in, C_pad), br_ref: (1, C_pad)]   only if use_res_matmul
    o_ref  : (tb, tt, C_pad)     lane-dense output tile
    [xh_scr: (tb, pad_r, C_in) f32, hh_scr: (tb, pad_r, C_pad) f32]  if pad>0
    """
    idx = 0
    if use_res_matmul:
        wr_ref, br_ref = rest[0], rest[1]
        idx = 2
    o_ref = rest[idx]
    idx += 1
    if pad > 0:
        xh_scr, hh_scr = rest[idx], rest[idx + 1]

    f32 = jnp.float32
    cd = compute_dtype
    tb = x_ref.shape[0]
    C_in = x_ref.shape[2]
    C_pad = o_ref.shape[2]
    d = dilation
    M = tb * tt
    off = pad_r - pad                 # first `off` carry rows are never read
    j = pl.program_id(1)              # time-tile index (sequential)

    # Reset the causal carries at the start of each batch tile's time sweep.
    # These zeros ARE the causal left zero-padding of conv1 and conv2.
    if pad > 0:
        @pl.when(j == 0)
        def _():
            xh_scr[...] = jnp.zeros_like(xh_scr)
            hh_scr[...] = jnp.zeros_like(hh_scr)

    x_cur = x_ref[...].astype(f32)                          # (tb, tt, C_in)

    # ---- conv1 (causal, dilated): K accumulated MXU dots over tt rows ------
    if pad > 0:
        xwin = jnp.concatenate([xh_scr[...], x_cur], axis=1)   # (tb, pad_r+tt, C_in)
    else:
        xwin = x_cur
    xwin_c = xwin.astype(cd)
    h = jnp.zeros((M, C_pad), f32)
    for k in range(K):                                      # K is small: unrolled
        xk = xwin_c[:, off + k * d: off + k * d + tt, :].reshape(M, C_in)
        h = h + jnp.dot(xk, w1_ref[k], preferred_element_type=f32)
    h = jnp.maximum(h + b1_ref[...], 0.0)                   # bias + ReLU (dropout1 = id)
    h3 = h.reshape(tb, tt, C_pad)

    # ---- conv2 (causal, dilated): K accumulated MXU dots -------------------
    # TODO(synk): for C_pad <= 128 on v6e/v7x a fused im2col dot (contraction
    # K*C_pad) fills the 256-deep MXU better; per-tap dots are the safe
    # default (full depth on v5e, no K*|h| lane-concat VMEM / vst traffic).
    if pad > 0:
        hwin = jnp.concatenate([hh_scr[...], h3], axis=1)       # (tb, pad_r+tt, C_pad)
    else:
        hwin = h3
    hwin_c = hwin.astype(cd)
    out = jnp.zeros((M, C_pad), f32)
    for k in range(K):
        hk = hwin_c[:, off + k * d: off + k * d + tt, :].reshape(M, C_pad)
        out = out + jnp.dot(hk, w2_ref[k], preferred_element_type=f32)
    out = jnp.maximum(out + b2_ref[...], 0.0)               # bias + ReLU (dropout2 = id)

    # ---- residual branch ----------------------------------------------------
    x_flat = x_cur.reshape(M, C_in)
    if use_res_matmul:
        # real 1x1 downsample (compute dtype) OR exact f32 identity when the
        # residual is identity but C_out is not lane-aligned.
        res = jnp.dot(x_flat.astype(wr_ref.dtype), wr_ref[...],
                      preferred_element_type=f32) + br_ref[...]
    else:
        # identity residual with C_in == C_pad: pure pass-through, no matmul.
        res = x_flat

    y = jnp.maximum(out + res, 0.0)
    o_ref[...] = y.reshape(tb, tt, C_pad).astype(o_ref.dtype)

    # ---- carry the causal halos (last pad_r rows of x and h) forward -------
    if pad > 0 and n_time_tiles > 1:
        if tt >= pad_r:
            xh_scr[...] = x_cur[:, tt - pad_r:, :]
            hh_scr[...] = h3[:, tt - pad_r:, :]
        else:
            # tile shorter than the receptive field: roll the carry
            xh_scr[...] = jnp.concatenate([xh_scr[:, tt:, :], x_cur], axis=1)
            hh_scr[...] = jnp.concatenate([hh_scr[:, tt:, :], h3], axis=1)


# ------------------------------ JAX wrapper ----------------------------------
def _vmem_limit_bytes():
    """Per-generation VMEM budget: ~half of physical (32 MiB on v7x's 64 MiB,
    64 MiB on v5e/v6e's 128 MiB), clamped to [32 MiB, 100 MiB]."""
    cap = 128 * 1024 * 1024
    try:
        info = pltpu.get_tpu_info()
        for attr in ("vmem_capacity_bytes", "vmem_size_bytes", "vmem_bytes"):
            val = getattr(info, attr, None)
            if val:
                cap = int(val)
                break
    except Exception:
        pass
    return int(min(max(cap // 2, 32 * 1024 * 1024), 100 * 1024 * 1024))


def _pick_time_tile(T, tb, C_in, C_pad, pad_r, weight_bytes, budget_bytes):
    cands = sorted({t for t in range(8, T + 1, 8) if T % t == 0} | {T},
                   reverse=True)

    def est(t):
        x_tile = tb * t * C_in * 4
        o_tile = tb * t * C_pad * 4
        h_win = tb * (t + pad_r) * C_pad * 4
        carry = tb * pad_r * (C_in + C_pad) * 4
        # 2x x/out for double-buffered HBM<->VMEM pipelining; ~3x the h window
        # for the concat / per-tap slice temporaries.
        return 2 * x_tile + 2 * o_tile + 3 * h_win + carry + weight_bytes

    for t in cands:
        if est(t) <= budget_bytes:
            return t
    return cands[-1]


def temporal_block(x_btc, params, *, kernel_size, dilation,
                   block_b=None, block_t=None,
                   compute_dtype=jnp.bfloat16, keep_padded_output=False):
    """x_btc: (B, T, C_in) float32.  Returns (B, T, C_out).
    keep_padded_output=True returns the lane-dense (B, T, C_pad) layout (zero
    padded lanes) so a stack of TemporalBlocks can skip the wrapper slice."""
    B, T, C_in = x_btc.shape
    w1, b1, w2, b2, wd, bd = params
    K = kernel_size
    C_out = w1.shape[2]
    pad = (K - 1) * dilation
    pad_r = _round_up(pad, 8) if pad > 0 else 0   # sublane-aligned halo carry
    C_pad = _round_up(C_out, 128)                 # lane-dense stores / MXU N dim
    dC = C_pad - C_out
    has_downsample = wd is not None
    use_res_matmul = has_downsample or dC > 0     # static (trace-time) choice

    cd = compute_dtype
    f32 = jnp.float32

    # ---- weights: zero-pad out-channels to C_pad; MXU operands in cd -------
    w1p = jnp.pad(w1, ((0, 0), (0, 0), (0, dC))).astype(cd)      # (K, C_in, C_pad)
    b1p = jnp.pad(b1, (0, dC)).reshape(1, C_pad).astype(f32)
    w2p = jnp.pad(w2, ((0, 0), (0, dC), (0, dC))).astype(cd)     # (K, C_pad, C_pad)
    b2p = jnp.pad(b2, (0, dC)).reshape(1, C_pad).astype(f32)
    wrp = brp = None
    if has_downsample:
        wrp = jnp.pad(wd, ((0, 0), (0, dC))).astype(cd)          # (C_in, C_pad)
        brp = jnp.pad(bd, (0, dC)).reshape(1, C_pad).astype(f32)
    elif use_res_matmul:
        # identity residual but C_out not lane-aligned: tiny exact f32 identity
        # matmul (C_in = C_out < 128).  Lane-aligned case uses no matmul at all.
        wrp = jnp.pad(jnp.eye(C_in, dtype=f32), ((0, 0), (0, dC)))
        brp = jnp.zeros((1, C_pad), f32)

    # ---- tile selection ------------------------------------------------------
    if block_b is None:
        cand = [dv for dv in _divisors(B) if B // dv >= 2] or [B]
        tb = max(cand)                # keep >= 2 batch tiles for v7x megacore
    else:
        tb = block_b
    assert B % tb == 0, "batch tile must divide B"

    weight_bytes = 2 * sum(int(a.size) * a.dtype.itemsize
                           for a in (w1p, b1p, w2p, b2p))
    vmem_limit = _vmem_limit_bytes()
    if block_t is None:
        tt = _pick_time_tile(T, tb, C_in, C_pad, pad_r, weight_bytes,
                             budget_bytes=(vmem_limit * 3) // 4)
    else:
        tt = block_t
    assert T % tt == 0, "time tile must divide T"
    assert tt == T or tt % 8 == 0, "time tile must be a multiple of 8"
    n_time_tiles = T // tt

    grid = (B // tb, n_time_tiles)

    def rep_spec(arr):   # whole-array block, identical for every program
        shape = arr.shape
        return pl.BlockSpec(shape, lambda b, j: (0,) * len(shape))
        # TODO(synk): single-buffer these grid-invariant weights via
        # pipeline_mode=pl.Buffered(1) once verified on all deployed Mosaic
        # versions (saves one weight copy of VMEM).

    in_specs = [pl.BlockSpec((tb, tt, C_in), lambda b, j: (b, j, 0)),
                rep_spec(w1p), rep_spec(b1p), rep_spec(w2p), rep_spec(b2p)]
    inputs = [x_btc, w1p, b1p, w2p, b2p]
    if use_res_matmul:
        in_specs += [rep_spec(wrp), rep_spec(brp)]
        inputs += [wrp, brp]

    scratch_shapes = []
    if pad > 0:
        scratch_shapes = [pltpu.VMEM((tb, pad_r, C_in), f32),
                          pltpu.VMEM((tb, pad_r, C_pad), f32)]

    kern = functools.partial(
        temporal_block_kernel, tt=tt, K=K, dilation=dilation, pad=pad,
        pad_r=pad_r, n_time_tiles=n_time_tiles, compute_dtype=cd,
        use_res_matmul=use_res_matmul)

    out_padded = pl.pallas_call(
        kern,
        grid=grid,
        in_specs=in_specs,
        out_specs=pl.BlockSpec((tb, tt, C_pad), lambda b, j: (b, j, 0)),
        out_shape=jax.ShapeDtypeStruct((B, T, C_pad), x_btc.dtype),
        scratch_shapes=scratch_shapes,
        compiler_params=pltpu.CompilerParams(
            # batch parallel (feeds both v7x TensorCores),
            # time sequential (enables the VMEM halo carry).
            dimension_semantics=("parallel", "arbitrary"),
            vmem_limit_bytes=vmem_limit),
    )(*inputs)

    if dC and not keep_padded_output:
        return out_padded[:, :, :C_out]
    return out_padded


# ----------------------- pure-JAX reference (PyTorch semantics) ---------------
def ref_temporal_block(x_btc, params, *, kernel_size, dilation):
    w1, b1, w2, b2, wd, bd = params
    pad = (kernel_size - 1) * dilation
    x = jnp.transpose(x_btc, (0, 2, 1))                      # -> NCL like PyTorch
    T = x.shape[2]

    def conv(inp, w_kio, b):
        w_oik = jnp.transpose(w_kio, (2, 1, 0))              # (O, I, K)
        y = lax.conv_general_dilated(inp, w_oik, window_strides=(1,),
                                     padding=[(pad, pad)],
                                     rhs_dilation=(dilation,),
                                     dimension_numbers=('NCH', 'OIH', 'NCH'))
        return y + b[None, :, None]

    h = jnp.maximum(conv(x, w1, b1)[:, :, :T], 0.0)          # chomp + relu
    o = jnp.maximum(conv(h, w2, b2)[:, :, :T], 0.0)          # chomp + relu
    if wd is None:
        res = x
    else:
        wd_oik = jnp.transpose(wd, (1, 0))[:, :, None]       # (O, I, 1)
        res = lax.conv_general_dilated(x, wd_oik, (1,), 'VALID',
                                       dimension_numbers=('NCH', 'OIH', 'NCH'))
        res = res + bd[None, :, None]
    y = jnp.maximum(o + res, 0.0)
    return jnp.transpose(y, (0, 2, 1))


# ----------------------------- parameter init --------------------------------
def init_params(key, C_in, C_out, K):
    ks = jax.random.split(key, 6)

    def kaiming(k, shape, fan_in):      # kaiming_normal_, nonlinearity='relu'
        return math.sqrt(2.0 / fan_in) * jax.random.normal(k, shape, jnp.float32)

    def bias(k, n, fan_in):             # PyTorch default conv bias init
        bound = 1.0 / math.sqrt(fan_in)
        return jax.random.uniform(k, (n,), jnp.float32, -bound, bound)

    w1 = kaiming(ks[0], (K, C_in, C_out), C_in * K)
    b1 = bias(ks[1], C_out, C_in * K)
    w2 = kaiming(ks[2], (K, C_out, C_out), C_out * K)
    b2 = bias(ks[3], C_out, C_out * K)
    if C_in != C_out:
        wd = kaiming(ks[4], (C_in, C_out), C_in)
        bd = bias(ks[5], C_out, C_in)
    else:
        wd, bd = None, None
    return (w1, b1, w2, b2, wd, bd)


if __name__ == "__main__":
    key = jax.random.PRNGKey(0)
    kx, kp, kp2, kp3, kp4 = jax.random.split(key, 5)

    B, T = 2, 32
    K, dilation = 3, 2                     # causal padding = (K-1)*dilation = 4

    # --- case 1: downsample path (C_in != C_out), default bf16 MXU operands,
    #             tiled over batch & time (exercises the VMEM halo carry).
    C_in, C_out = 4, 8
    x = jax.random.normal(kx, (B, T, C_in), jnp.float32)
    params = init_params(kp, C_in, C_out, K)
    y_ref = ref_temporal_block(x, params, kernel_size=K, dilation=dilation)

    y_bf16 = temporal_block(x, params, kernel_size=K, dilation=dilation,
                            block_b=1, block_t=16)
    y_bf16 = jax.block_until_ready(y_bf16)
    assert y_bf16.shape == (B, T, C_out)
    assert jnp.allclose(y_bf16, y_ref, atol=2e-1, rtol=5e-2), \
        f"bf16 max abs err = {jnp.max(jnp.abs(y_bf16 - y_ref))}"

    # --- case 2: same weights, f32 compute, auto tile/VMEM selection.
    y_f32 = temporal_block(x, params, kernel_size=K, dilation=dilation,
                           compute_dtype=jnp.float32)
    y_f32 = jax.block_until_ready(y_f32)
    assert jnp.allclose(y_f32, y_ref, atol=1e-4, rtol=1e-4), \
        f"f32 max abs err = {jnp.max(jnp.abs(y_f32 - y_ref))}"

    # --- case 3: identity residual (C_in == C_out, not lane-aligned), f32.
    x2 = jax.random.normal(kx, (B, T, C_out), jnp.float32)
    params_id = init_params(kp2, C_out, C_out, K)
    y2 = temporal_block(x2, params_id, kernel_size=K, dilation=dilation,
                        block_b=1, block_t=8, compute_dtype=jnp.float32)
    y2 = jax.block_until_ready(y2)
    y2_ref = ref_temporal_block(x2, params_id, kernel_size=K, dilation=dilation)
    assert jnp.allclose(y2, y2_ref, atol=1e-4, rtol=1e-4), \
        f"identity-residual max abs err = {jnp.max(jnp.abs(y2 - y2_ref))}"

    # --- case 4: dilation larger than the time tile (receptive field spans
    #             several tiles -- exercises the rolling halo carry).
    K4, d4 = 2, 16                                       # pad = 16 > block_t = 8
    params4 = init_params(kp3, C_in, C_out, K4)
    y4 = temporal_block(x, params4, kernel_size=K4, dilation=d4,
                        block_b=1, block_t=8, compute_dtype=jnp.float32)
    y4 = jax.block_until_ready(y4)
    y4_ref = ref_temporal_block(x, params4, kernel_size=K4, dilation=d4)
    assert jnp.allclose(y4, y4_ref, atol=1e-4, rtol=1e-4), \
        f"large-dilation max abs err = {jnp.max(jnp.abs(y4 - y4_ref))}"

    # --- case 5: lane-aligned identity residual (C = 128): no residual matmul.
    C5 = 128
    x5 = jax.random.normal(kx, (B, T, C5), jnp.float32)
    params5 = init_params(kp4, C5, C5, K)
    y5 = temporal_block(x5, params5, kernel_size=K, dilation=dilation,
                        block_b=1, block_t=16, compute_dtype=jnp.float32)
    y5 = jax.block_until_ready(y5)
    y5_ref = ref_temporal_block(x5, params5, kernel_size=K, dilation=dilation)
    assert jnp.allclose(y5, y5_ref, atol=1e-4, rtol=1e-4), \
        f"lane-aligned identity max abs err = {jnp.max(jnp.abs(y5 - y5_ref))}"

    print("KERNEL_OK")
</pallas_src>

<mosaic_0001>
module attributes {stable_mosaic.version = 11 : i64} {
  func.func @temporal_block_kernel(%arg0: i32, %arg1: i32, %arg2: memref<1x16x4xf32, #tpu.memory_space<vmem>>, %arg3: memref<3x4x128xbf16, #tpu.memory_space<vmem>>, %arg4: memref<1x128xf32, #tpu.memory_space<vmem>>, %arg5: memref<3x128x128xbf16, #tpu.memory_space<vmem>>, %arg6: memref<1x128xf32, #tpu.memory_space<vmem>>, %arg7: memref<4x128xbf16, #tpu.memory_space<vmem>>, %arg8: memref<1x128xf32, #tpu.memory_space<vmem>>, %arg9: memref<1x16x128xf32, #tpu.memory_space<vmem>>, %arg10: memref<1x8x4xf32, #tpu.memory_space<vmem>>, %arg11: memref<1x8x128xf32, #tpu.memory_space<vmem>>) attributes {dimension_semantics = [#tpu.dimension_semantics<parallel>, #tpu.dimension_semantics<arbitrary>], iteration_bounds = array<i64: 2, 2>, scalar_prefetch = 0 : i64, scratch_operands = 2 : i64, tpu.core_type = #tpu.core_type<tc>, window_params = [{transform_indices = @transform_0, window_bounds = array<i64: 1, 16, 4>}, {pipeline_mode = #tpu.pipeline_mode<synchronous>, transform_indices = @transform_1, window_bounds = array<i64: 3, 4, 128>}, {pipeline_mode = #tpu.pipeline_mode<synchronous>, transform_indices = @transform_2, window_bounds = array<i64: 1, 128>}, {pipeline_mode = #tpu.pipeline_mode<synchronous>, transform_indices = @transform_3, window_bounds = array<i64: 3, 128, 128>}, {pipeline_mode = #tpu.pipeline_mode<synchronous>, transform_indices = @transform_4, window_bounds = array<i64: 1, 128>}, {pipeline_mode = #tpu.pipeline_mode<synchronous>, transform_indices = @transform_5, window_bounds = array<i64: 4, 128>}, {pipeline_mode = #tpu.pipeline_mode<synchronous>, transform_indices = @transform_6, window_bounds = array<i64: 1, 128>}, {transform_indices = @transform_7, window_bounds = array<i64: 1, 16, 128>}]} {
    %c0_i32 = arith.constant 0 : i32
    %0 = arith.cmpi eq, %arg1, %c0_i32 : i32
    %1 = arith.extui %0 : i1 to i32
    %c0_i32_0 = arith.constant 0 : i32
    %2 = arith.cmpi ne, %1, %c0_i32_0 : i32
    scf.if %2 {
      %cst_53 = arith.constant 0.000000e+00 : f32
      %75 = vector.broadcast %cst_53 : f32 to vector<1x8x4xf32>
      %c0_54 = arith.constant 0 : index
      %c0_55 = arith.constant 0 : index
      %c0_56 = arith.constant 0 : index
      %76 = vector.load %arg10[%c0_54, %c0_55, %c0_56] : memref<1x8x4xf32, #tpu.memory_space<vmem>>, vector<1x8x4xf32>
      tpu.vector_store %arg10[%c0_54, %c0_55, %c0_56], %75 {strides = array<i32>} : memref<1x8x4xf32, #tpu.memory_space<vmem>>, vector<1x8x4xf32>,
      %cst_57 = arith.constant 0.000000e+00 : f32
      %77 = vector.broadcast %cst_57 : f32 to vector<1x8x128xf32>
      %c0_58 = arith.constant 0 : index
      %c0_59 = arith.constant 0 : index
      %c0_60 = arith.constant 0 : index
      %78 = vector.load %arg11[%c0_58, %c0_59, %c0_60] : memref<1x8x128xf32, #tpu.memory_space<vmem>>, vector<1x8x128xf32>
      tpu.vector_store %arg11[%c0_58, %c0_59, %c0_60], %77 {strides = array<i32>} : memref<1x8x128xf32, #tpu.memory_space<vmem>>, vector<1x8x128xf32>,
    } else {
    }
    %c0 = arith.constant 0 : index
    %c0_1 = arith.constant 0 : index
    %c0_2 = arith.constant 0 : index
    %3 = vector.load %arg2[%c0, %c0_1, %c0_2] : memref<1x16x4xf32, #tpu.memory_space<vmem>>, vector<1x16x4xf32>
    %c0_3 = arith.constant 0 : index
    %c0_4 = arith.constant 0 : index
    %c0_5 = arith.constant 0 : index
    %4 = vector.load %arg10[%c0_3, %c0_4, %c0_5] : memref<1x8x4xf32, #tpu.memory_space<vmem>>, vector<1x8x4xf32>
    %5 = tpu.concatenate %4, %3 in 1 : vector<1x8x4xf32>, vector<1x16x4xf32> -> vector<1x24x4xf32>
    %6 = arith.truncf %5 : vector<1x24x4xf32> to vector<1x24x4xbf16>
    %cst = arith.constant 0.000000e+00 : f32
    %7 = vector.broadcast %cst : f32 to vector<16x128xf32>
    %8 = vector.extract_strided_slice %6 {offsets = [0, 4, 0], sizes = [1, 16, 4], strides = [1, 1, 1]} : vector<1x24x4xbf16> to vector<1x16x4xbf16>
    %9 = vector.shape_cast %8 : vector<1x16x4xbf16> to vector<16x4xbf16>
    %c0_6 = arith.constant 0 : index
    %c0_7 = arith.constant 0 : index
    %c0_8 = arith.constant 0 : index
    %10 = vector.load %arg3[%c0_6, %c0_7, %c0_8] : memref<3x4x128xbf16, #tpu.memory_space<vmem>>, vector<1x4x128xbf16>
    %11 = vector.shape_cast %10 : vector<1x4x128xbf16> to vector<4x128xbf16>
    %cst_9 = arith.constant dense<0.000000e+00> : vector<16x128xf32>
    %12 = tpu.matmul %9, %11, %cst_9 {dimension_numbers = #tpu.dot_dimension_numbers<[1], [0], [0], [1], [0, 0, 1, 1], [], []>} : vector<16x4xbf16>, vector<4x128xbf16>, vector<16x128xf32> -> vector<16x128xf32>
    %13 = arith.addf %7, %12 : vector<16x128xf32>
    %14 = vector.extract_strided_slice %6 {offsets = [0, 6, 0], sizes = [1, 16, 4], strides = [1, 1, 1]} : vector<1x24x4xbf16> to vector<1x16x4xbf16>
    %15 = vector.shape_cast %14 : vector<1x16x4xbf16> to vector<16x4xbf16>
    %c1 = arith.constant 1 : index
    %c0_10 = arith.constant 0 : index
    %c0_11 = arith.constant 0 : index
    %16 = vector.load %arg3[%c1, %c0_10, %c0_11] : memref<3x4x128xbf16, #tpu.memory_space<vmem>>, vector<1x4x128xbf16>
    %17 = vector.shape_cast %16 : vector<1x4x128xbf16> to vector<4x128xbf16>
    %cst_12 = arith.constant dense<0.000000e+00> : vector<16x128xf32>
    %18 = tpu.matmul %15, %17, %cst_12 {dimension_numbers = #tpu.dot_dimension_numbers<[1], [0], [0], [1], [0, 0, 1, 1], [], []>} : vector<16x4xbf16>, vector<4x128xbf16>, vector<16x128xf32> -> vector<16x128xf32>
    %19 = arith.addf %13, %18 : vector<16x128xf32>
    %20 = vector.extract_strided_slice %6 {offsets = [0, 8, 0], sizes = [1, 16, 4], strides = [1, 1, 1]} : vector<1x24x4xbf16> to vector<1x16x4xbf16>
    %21 = vector.shape_cast %20 : vector<1x16x4xbf16> to vector<16x4xbf16>
    %c2 = arith.constant 2 : index
    %c0_13 = arith.constant 0 : index
    %c0_14 = arith.constant 0 : index
    %22 = vector.load %arg3[%c2, %c0_13, %c0_14] : memref<3x4x128xbf16, #tpu.memory_space<vmem>>, vector<1x4x128xbf16>
    %23 = vector.shape_cast %22 : vector<1x4x128xbf16> to vector<4x128xbf16>
    %cst_15 = arith.constant dense<0.000000e+00> : vector<16x128xf32>
    %24 = tpu.matmul %21, %23, %cst_15 {dimension_numbers = #tpu.dot_dimension_numbers<[1], [0], [0], [1], [0, 0, 1, 1], [], []>} : vector<16x4xbf16>, vector<4x128xbf16>, vector<16x128xf32> -> vector<16x128xf32>
    %25 = arith.addf %19, %24 : vector<16x128xf32>
    %c0_16 = arith.constant 0 : index
    %c0_17 = arith.constant 0 : index
    %26 = vector.load %arg4[%c0_16, %c0_17] : memref<1x128xf32, #tpu.memory_space<vmem>>, vector<1x128xf32>
    %27 = vector.broadcast %26 : vector<1x128xf32> to vector<16x128xf32>
    %28 = arith.addf %25, %27 : vector<16x128xf32>
    %cst_18 = arith.constant 0.000000e+00 : f32
    %29 = vector.broadcast %cst_18 : f32 to vector<16x128xf32>
    %30 = arith.maximumf %28, %29 : vector<16x128xf32>
    %31 = vector.shape_cast %30 : vector<16x128xf32> to vector<1x16x128xf32>
    %c0_19 = arith.constant 0 : index
    %c0_20 = arith.constant 0 : index
    %c0_21 = arith.constant 0 : index
    %32 = vector.load %arg11[%c0_19, %c0_20, %c0_21] : memref<1x8x128xf32, #tpu.memory_space<vmem>>, vector<1x8x128xf32>
    %33 = tpu.concatenate %32, %31 in 1 : vector<1x8x128xf32>, vector<1x16x128xf32> -> vector<1x24x128xf32>
    %34 = arith.truncf %33 : vector<1x24x128xf32> to vector<1x24x128xbf16>
    %cst_22 = arith.constant 0.000000e+00 : f32
    %35 = vector.broadcast %cst_22 : f32 to vector<16x128xf32>
    %36 = vector.extract_strided_slice %34 {offsets = [0, 4, 0], sizes = [1, 16, 128], strides = [1, 1, 1]} : vector<1x24x128xbf16> to vector<1x16x128xbf16>
    %37 = vector.shape_cast %36 : vector<1x16x128xbf16> to vector<16x128xbf16>
    %c0_23 = arith.constant 0 : index
    %c0_24 = arith.constant 0 : index
    %c0_25 = arith.constant 0 : index
    %38 = vector.load %arg5[%c0_23, %c0_24, %c0_25] : memref<3x128x128xbf16, #tpu.memory_space<vmem>>, vector<1x128x128xbf16>
    %39 = vector.shape_cast %38 : vector<1x128x128xbf16> to vector<128x128xbf16>
    %cst_26 = arith.constant dense<0.000000e+00> : vector<16x128xf32>
    %40 = tpu.matmul %37, %39, %cst_26 {dimension_numbers = #tpu.dot_dimension_numbers<[1], [0], [0], [1], [0, 0, 1, 1], [], []>} : vector<16x128xbf16>, vector<128x128xbf16>, vector<16x128xf32> -> vector<16x128xf32>
    %41 = arith.addf %35, %40 : vector<16x128xf32>
    %42 = vector.extract_strided_slice %34 {offsets = [0, 6, 0], sizes = [1, 16, 128], strides = [1, 1, 1]} : vector<1x24x128xbf16> to vector<1x16x128xbf16>
    %43 = vector.shape_cast %42 : vector<1x16x128xbf16> to vector<16x128xbf16>
    %c1_27 = arith.constant 1 : index
    %c0_28 = arith.constant 0 : index
    %c0_29 = arith.constant 0 : index
    %44 = vector.load %arg5[%c1_27, %c0_28, %c0_29] : memref<3x128x128xbf16, #tpu.memory_space<vmem>>, vector<1x128x128xbf16>
    %45 = vector.shape_cast %44 : vector<1x128x128xbf16> to vector<128x128xbf16>
    %cst_30 = arith.constant dense<0.000000e+00> : vector<16x128xf32>
    %46 = tpu.matmul %43, %45, %cst_30 {dimension_numbers = #tpu.dot_dimension_numbers<[1], [0], [0], [1], [0, 0, 1, 1], [], []>} : vector<16x128xbf16>, vector<128x128xbf16>, vector<16x128xf32> -> vector<16x128xf32>
    %47 = arith.addf %41, %46 : vector<16x128xf32>
    %48 = vector.extract_strided_slice %34 {offsets = [0, 8, 0], sizes = [1, 16, 128], strides = [1, 1, 1]} : vector<1x24x128xbf16> to vector<1x16x128xbf16>
    %49 = vector.shape_cast %48 : vector<1x16x128xbf16> to vector<16x128xbf16>
    %c2_31 = arith.constant 2 : index
    %c0_32 = arith.constant 0 : index
    %c0_33 = arith.constant 0 : index
    %50 = vector.load %arg5[%c2_31, %c0_32, %c0_33] : memref<3x128x128xbf16, #tpu.memory_space<vmem>>, vector<1x128x128xbf16>
    %51 = vector.shape_cast %50 : vector<1x128x128xbf16> to vector<128x128xbf16>
    %cst_34 = arith.constant dense<0.000000e+00> : vector<16x128xf32>
    %52 = tpu.matmul %49, %51, %cst_34 {dimension_numbers = #tpu.dot_dimension_numbers<[1], [0], [0], [1], [0, 0, 1, 1], [], []>} : vector<16x128xbf16>, vector<128x128xbf16>, vector<16x128xf32> -> vector<16x128xf32>
    %53 = arith.addf %47, %52 : vector<16x128xf32>
    %c0_35 = arith.constant 0 : index
    %c0_36 = arith.constant 0 : index
    %54 = vector.load %arg6[%c0_35, %c0_36] : memref<1x128xf32, #tpu.memory_space<vmem>>, vector<1x128xf32>
    %55 = vector.broadcast %54 : vector<1x128xf32> to vector<16x128xf32>
    %56 = arith.addf %53, %55 : vector<16x128xf32>
    %cst_37 = arith.constant 0.000000e+00 : f32
    %57 = vector.broadcast %cst_37 : f32 to vector<16x128xf32>
    %58 = arith.maximumf %56, %57 : vector<16x128xf32>
    %59 = vector.shape_cast %3 : vector<1x16x4xf32> to vector<16x4xf32>
    %60 = arith.truncf %59 : vector<16x4xf32> to vector<16x4xbf16>
    %c0_38 = arith.constant 0 : index
    %c0_39 = arith.constant 0 : index
    %61 = vector.load %arg7[%c0_38, %c0_39] : memref<4x128xbf16, #tpu.memory_space<vmem>>, vector<4x128xbf16>
    %cst_40 = arith.constant dense<0.000000e+00> : vector<16x128xf32>
    %62 = tpu.matmul %60, %61, %cst_40 {dimension_numbers = #tpu.dot_dimension_numbers<[1], [0], [0], [1], [0, 0, 1, 1], [], []>} : vector<16x4xbf16>, vector<4x128xbf16>, vector<16x128xf32> -> vector<16x128xf32>
    %c0_41 = arith.constant 0 : index
    %c0_42 = arith.constant 0 : index
    %63 = vector.load %arg8[%c0_41, %c0_42] : memref<1x128xf32, #tpu.memory_space<vmem>>, vector<1x128xf32>
    %64 = vector.broadcast %63 : vector<1x128xf32> to vector<16x128xf32>
    %65 = arith.addf %62, %64 : vector<16x128xf32>
    %66 = arith.addf %58, %65 : vector<16x128xf32>
    %cst_43 = arith.constant 0.000000e+00 : f32
    %67 = vector.broadcast %cst_43 : f32 to vector<16x128xf32>
    %68 = arith.maximumf %66, %67 : vector<16x128xf32>
    %69 = vector.shape_cast %68 : vector<16x128xf32> to vector<1x16x128xf32>
    %c0_44 = arith.constant 0 : index
    %c0_45 = arith.constant 0 : index
    %c0_46 = arith.constant 0 : index
    %70 = vector.load %arg9[%c0_44, %c0_45, %c0_46] : memref<1x16x128xf32, #tpu.memory_space<vmem>>, vector<1x16x128xf32>
    tpu.vector_store %arg9[%c0_44, %c0_45, %c0_46], %69 {strides = array<i32>} : memref<1x16x128xf32, #tpu.memory_space<vmem>>, vector<1x16x128xf32>,
    %71 = vector.extract_strided_slice %3 {offsets = [0, 8, 0], sizes = [1, 8, 4], strides = [1, 1, 1]} : vector<1x16x4xf32> to vector<1x8x4xf32>
    %c0_47 = arith.constant 0 : index
    %c0_48 = arith.constant 0 : index
    %c0_49 = arith.constant 0 : index
    %72 = vector.load %arg10[%c0_47, %c0_48, %c0_49] : memref<1x8x4xf32, #tpu.memory_space<vmem>>, vector<1x8x4xf32>
    tpu.vector_store %arg10[%c0_47, %c0_48, %c0_49], %71 {strides = array<i32>} : memref<1x8x4xf32, #tpu.memory_space<vmem>>, vector<1x8x4xf32>,
    %73 = vector.extract_strided_slice %31 {offsets = [0, 8, 0], sizes = [1, 8, 128], strides = [1, 1, 1]} : vector<1x16x128xf32> to vector<1x8x128xf32>
    %c0_50 = arith.constant 0 : index
    %c0_51 = arith.constant 0 : index
    %c0_52 = arith.constant 0 : index
    %74 = vector.load %arg11[%c0_50, %c0_51, %c0_52] : memref<1x8x128xf32, #tpu.memory_space<vmem>>, vector<1x8x128xf32>
    tpu.vector_store %arg11[%c0_50, %c0_51, %c0_52], %73 {strides = array<i32>} : memref<1x8x128xf32, #tpu.memory_space<vmem>>, vector<1x8x128xf32>,
    return
  }
  func.func @transform_0(%arg0: i32, %arg1: i32) -> (i32, i32, i32) {
    %c0_i32 = arith.constant 0 : i32
    %c0_i32_0 = arith.constant 0 : i32
    return %arg0, %arg1, %c0_i32 : i32, i32, i32
  }
  func.func @transform_1(%arg0: i32, %arg1: i32) -> (i32, i32, i32) {
    %c0_i32 = arith.constant 0 : i32
    %c0_i32_0 = arith.constant 0 : i32
    %c0_i32_1 = arith.constant 0 : i32
    %c0_i32_2 = arith.constant 0 : i32
    return %c0_i32, %c0_i32_0, %c0_i32_1 : i32, i32, i32
  }
  func.func @transform_2(%arg0: i32, %arg1: i32) -> (i32, i32) {
    %c0_i32 = arith.constant 0 : i32
    %c0_i32_0 = arith.constant 0 : i32
    %c0_i32_1 = arith.constant 0 : i32
    return %c0_i32, %c0_i32_0 : i32, i32
  }
  func.func @transform_3(%arg0: i32, %arg1: i32) -> (i32, i32, i32) {
    %c0_i32 = arith.constant 0 : i32
    %c0_i32_0 = arith.constant 0 : i32
    %c0_i32_1 = arith.constant 0 : i32
    %c0_i32_2 = arith.constant 0 : i32
    return %c0_i32, %c0_i32_0, %c0_i32_1 : i32, i32, i32
  }
  func.func @transform_4(%arg0: i32, %arg1: i32) -> (i32, i32) {
    %c0_i32 = arith.constant 0 : i32
    %c0_i32_0 = arith.constant 0 : i32
    %c0_i32_1 = arith.constant 0 : i32
    return %c0_i32, %c0_i32_0 : i32, i32
  }
  func.func @transform_5(%arg0: i32, %arg1: i32) -> (i32, i32) {
    %c0_i32 = arith.constant 0 : i32
    %c0_i32_0 = arith.constant 0 : i32
    %c0_i32_1 = arith.constant 0 : i32
    return %c0_i32, %c0_i32_0 : i32, i32
  }
  func.func @transform_6(%arg0: i32, %arg1: i32) -> (i32, i32) {
    %c0_i32 = arith.constant 0 : i32
    %c0_i32_0 = arith.constant 0 : i32
    %c0_i32_1 = arith.constant 0 : i32
    return %c0_i32, %c0_i32_0 : i32, i32
  }
  func.func @transform_7(%arg0: i32, %arg1: i32) -> (i32, i32, i32) {
    %c0_i32 = arith.constant 0 : i32
    %c0_i32_0 = arith.constant 0 : i32
    return %arg0, %arg1, %c0_i32 : i32, i32, i32
  }
}

</mosaic_0001>

<bundles_post_ra>
// kernel: tpu_custom_call.1
= control target key start
LH: loop header
LB: loop body
LE: loop exit
PB: predicated region body
PF: predicated region fallthrough
CT: control target
= control target key end

     0   :  { %s1458_s0 = inlined_call_operand.vmem [shape: f32[2,32,4], index: 0, kind: input, shape index: {}]   ;;  %s1459_s1 = inlined_call_operand.vmem [shape: bf16[3,4,128], index: 1, kind: input, shape index: {}]   ;;  %s1460_s2 = inlined_call_operand.vmem [shape: f32[1,128], index: 2, kind: input, shape index: {}]   ;;  %s1461_s3 = inlined_call_operand.hbm [shape: bf16[3,128,128], index: 3, kind: input, shape index: {}]   ;;  %s1462_s4 = inlined_call_operand.vmem [shape: f32[1,128], index: 4, kind: input, shape index: {}]   ;;  %s1463_s5 = inlined_call_operand.vmem [shape: bf16[4,128], index: 5, kind: input, shape index: {}]   ;;  %s1464_s6 = inlined_call_operand.vmem [shape: f32[1,128], index: 6, kind: input, shape index: {}]   ;;  %s1465_s7 = inlined_call_operand.hbm [shape: f32[2,32,128], index: 7, kind: output, shape index: {}]  }
   0x1   :  { %1469 = sst [smem:[#allocation12_spill]] %s1461_s3 }
   0x2   :  { %12 = vsyncpa [#allocation5], 0 }
   0x3   :  { %13 = vsyncpa [#allocation6], 0 }
   0x4   :  { %15 = vsyncpa [#allocation6 + $0x1], 0  ;;  %s1257_s24 = smov 0   ;;  %s1259_s25 = smov 0  }
   0x5   :  { %s1261_s26 = smov 0   ;;  %s1263_s27 = smov 0  }
   0x6   :  { %s1265_s28 = smov 0   ;;  %s1267_s29 = smov 0  }
   0x7   :  { %s1269_s30 = smov 0   ;;  %s1271_s8 = smov 0  }
   0x8 LB: > { %s847_s9 = sadd.s32 4294967295, %s1209_s8   ;;  %s848_s10 = sadd.s32 4294967294, %s1209_s8   ;;  %s1209_s8 = sphi %s1271_s8, %s21_s8   ;;  %s1205_s30 = sphi %s1269_s30, %s1486_s30   ;;  %s1201_s29 = sphi %s1267_s29, %s1485_s29   ;;  %s1197_s28 = sphi %s1265_s28, %s1484_s28   ;;  %s1193_s27 = sphi %s1263_s27, %s1483_s27   ;;  %s1189_s26 = sphi %s1261_s26, %s1482_s26   ;;  %s1185_s25 = sphi %s1259_s25, %s1481_s25   ;;  %s1181_s24 = sphi %s1257_s24, %s1480_s24  }
   0x9   : > { %s30_s11 = sadd.s32 1, %s1201_s29  ;;  %s33_s12 = sadd.s32 1, %s1205_s30 }
   0xa   : > { %p31_p0 = scmp.ge.s32.totalorder %s30_s11, 2  ;;  %s196_s13 = sadd.s32 1, %s1189_s26 }
   0xb   : > { %p206_p1 = scmp.ne.s32.totalorder %s1189_s26, %s1185_s25  ;;  %p207_p2 = scmp.eq.s32.totalorder %s847_s9, 3 }
   0xc   : > { %s1488_s11 = smov (%p31_p0, %s30_s11), 0  ;;  %s1490_s12 = smov (!%p31_p0, %s33_s12), %s1205_s30 }
   0xd   : > { %1470 = sst [smem:[#allocation10_spill]] %s1488_s11  ;;  %s192_s14 = ssub.s32 %s1201_s29, %s1488_s11 }
   0xe   : > { %p1309_p3 = por %p207_p2, %p206_p1  ;;  %p35_p4 = scmp.ge.s32.totalorder %s1490_s12, 2 }
   0xf   : > { %p212_p5 = scmp.ne.s32.totalorder %s1185_s25, %s1181_s24  ;;  %p213_p6 = scmp.eq.s32.totalorder %s848_s10, 3 }
  0x10   : > { %p849_p7 = scmp.ge.s32.totalorder %s1209_s8, 1  ;;  %s1492_s12 = smov (%p35_p4, %s1490_s12), 0 }
  0x11   : > { %1472 = sst [smem:[#allocation11_spill]] %s1492_s12  ;;  %p1318_p8 = por %p213_p6, %p212_p5 }
  0x12   : > { %p220_p9 = scmp.lt.s32.totalorder %s1209_s8, 5  ;;  %s191_s17 = ssub.s32 %s1205_s30, %s1492_s12 }
  0x13   : > { %s193_s18 = sor.u32 %s192_s14, %s191_s17  ;;  %p1329_p12 = scmp.eq.s32.totalorder %s847_s9, 0 }
  0x14   : > { %p1325_p10 = pnand %p849_p7, %p220_p9  ;;  %p194_p11 = scmp.eq.s32.totalorder %s193_s18, 0 }
  0x15   : > { %s1476_s3 = sld [smem:[#allocation12_spill]]  ;;  %s1211_s14 = smov [#allocation4]  }
  0x16   : > { %p997_p13 = pneg %p1325_p10  ;;  %s239_s17 = sshll.u32 %s1211_s14, 4  ;;  %s240_s17 = int_to_ptr.vmem [resolvable:$true] %s239_s17 }
  0x17   : > { %s1339_s10 = scalar_select %p194_p11, %s1189_s26, %s196_s13  }
  0x18   : > { %p998_p0 = pnand %p1329_p12, %p997_p13  ;;  %s1212_s18 = smov 64  }
  0x19   : > { %s1213_s9 = smov 4   ;;  %277 = sbr.rel (%p1325_p10) target bundleno = 368 (0x170), region = 48 }
  0x1b   : > { %s237_s23 = sshll.u32 %s1476_s3, 4  ;;  %s238_s23 = int_to_ptr.hbm [resolvable:$true] %s237_s23 }
  0x1c   : > { %1000 = dma.hbm_to_vmem [thread:$0]  (!%p998_p0), %s238_s23, 3072, %s240_s17, [#allocation5], %s1212_s18, %s1212_s18, %s1213_s9  }
  0x1e   : > { %1172 = dma.done.wait (%p1329_p12), [#allocation5], 3072  }
  0x1f   : > { %1174 = vsyncadd (%p1329_p12), [#allocation5], 4294964224  ;;  %s1467_s13 = sand.u32 1, %s1185_s25   ;;  %s1351_s21 = sshll.u32 %s1193_s27, 1 }
  0x20   : > { %s854_s22 = sshll.u32 %s1467_s13, 4  ;;  %p315_p1 = scmp.lt.s32.totalorder %s1197_s28, 1 }
  0x21   : > { %p317_p2 = scmp.lt.s32.totalorder %s1351_s21, 3  ;;  %s1362_s12 = scalar_lea.vmem [#allocation7], %s854_s22 }
  0x22   : > { %s316_s19 = scalar_select %p315_p1, %s1197_s28, 1 }
  0x23   : > { %s318_s23 = scalar_select %p317_p2, %s1351_s21, 3 }
  0x24   : > { %s856_s14 = sshll.u32 %s316_s19, 2  ;;  %p858_p4 = scmp.ne.s32.totalorder %s1193_s27, 0 }
  0x25   : > { %s320_s17 = sadd.s32 %s856_s14, %s318_s23 }
  0x26   : > { %s857_s20 = sshll.u32 %s320_s17, 3  ;;  %329 = sbr.rel (%p858_p4) target bundleno = 46 (0x2e), region = 56 }
  0x27   : > { %s322_s3 = scalar_lea.vmem %s1458_s0, %s857_s20 }
  0x2b   : > { %vm330_vm0 = vcmask 31744   ;;  %v1214_v0 = vmov 0.0  }
  0x2c   : > { %331 = vst.msk [vmem:[#allocation2] sm:$0xff] %vm330_vm0, %v1214_v0 }
  0x2d   : > { %332 = vst [vmem:[#allocation3] sm:$0xff] %v1214_v0 }
  0x2e PF: > { %vm358_vm1 = vcmask 1041408   ;;  %v862_v1 = vld [vmem:[%s1459_s1 + $0x4] sm:$0x3]  ;;  %v859_v2 = vld [vmem:[%s1459_s1 + $0x2] sm:$0x3]  ;;  %v1378_v7 = vld [vmem:[%s322_s3 + $0x8] sm:$0xff] }
  0x2f   : > { %v1371_v3 = vld [vmem:[%s322_s3] sm:$0xff]  ;;  %v407_v4 = vsel %vm358_vm1, %v862_v1, 0  ;;  %v360_v5 = vsel %vm358_vm1, %v859_v2, 0  ;;  %v338_v12 = vpack.c.bf16 %v1378_v7, %v1378_v7  ;;  %vm354_vm2 = vcmask 31744   ;;  %v990_v13 = vld [vmem:[#allocation4 + $0xb8] sm:$0xff]  ;;  %v988_v31 = vld [vmem:[#allocation4 + $0xa8] sm:$0xff] }
  0x30   : > { %v339_v6 = vld [vmem:[%s1459_s1] sm:$0x3]  ;;  %v337_v9 = vpack.c.bf16 %v1371_v3, %v1371_v3  ;;  %416 = vmatpush.bf16.msra.mxu2 %v407_v4  ;;  %369 = vmatpush.bf16.msra.mxu0 %v360_v5  ;;  %v982_v14 = vld [vmem:[#allocation4 + $0x78] sm:$0xff]  ;;  %vm350_vm3 = vcmask 1044480   ;;  %vm376_vm4 = vcmask 1045504   ;;  %v980_v32 = vld [vmem:[#allocation4 + $0x68] sm:$0xff]  ;;  %v701_v51 = vpack.c.bf16 %v1378_v7, %v1371_v3 }
  0x31   : > { %v384_v10 = vsel %vm358_vm1, %v339_v6, 0  ;;  %v974_v15 = vld [vmem:[#allocation4 + $0x38] sm:$0xff]  ;;  %v347_v18 = vunpack.c.l.b16 %v338_v12  ;;  %530 = vmatpush.bf16.msra.mxu3 %v982_v14  ;;  %v989_v19 = vld [vmem:[#allocation4 + $0xb0] sm:$0xff]  ;;  %v972_v33 = vld [vmem:[#allocation4 + $0x28] sm:$0xff]  ;;  %s963_s19 = sshll.u32 %s1197_s28, 2  ;;  %s1477_s13 = sand.u32 1, %s1185_s25  }
  0x32   : > { %393 = vmatpush.bf16.msra.mxu1 %v384_v10  ;;  %v346_v16 = vunpack.c.l.b16 %v337_v9  ;;  %v981_v29 = vld [vmem:[#allocation4 + $0x70] sm:$0xff]  ;;  %v987_v34 = vld [vmem:[#allocation4 + $0xa0] sm:$0xff]  ;;  %v986_v37 = vld [vmem:[#allocation4 + $0x98] sm:$0xff]  ;;  %s747_s23 = sadd.s32 %s963_s19, %s1351_s21  ;;  %s750_s21 = sshll.u32 %s1362_s12, 4  ;;  %s751_s21 = int_to_ptr.vmem [resolvable:$true] %s750_s21 }
  0x33   : > { %v335_v8 = vld [vmem:[#allocation2] sm:$0xff]  ;;  %v349_v21 = vpack.c.b16 %v347_v18, %v347_v18  ;;  %v979_v35 = vld [vmem:[#allocation4 + $0x60] sm:$0xff]  ;;  %v978_v38 = vld [vmem:[#allocation4 + $0x58] sm:$0xff]  ;;  %s964_s27 = sshll.u32 %s747_s23, 3  ;;  %s736_s14 = scalar_lea.sflag [#allocation6], %s1477_s13 }
  0x34   : > { %v336_v11 = vpack.c.bf16 %v335_v8, %v335_v8  ;;  %733 = vst.msk [vmem:[#allocation2] sm:$0xff] %vm354_vm2, %v1378_v7  ;;  %596 = vmatpush.bf16.msrb.mxu0 %v974_v15  ;;  %v402_v22 = vpack.c.b16 %v347_v18, %v346_v16  ;;  %v973_v30 = vld [vmem:[#allocation4 + $0x30] sm:$0xff]  ;;  %v971_v36 = vld [vmem:[#allocation4 + $0x20] sm:$0xff]  ;;  %v970_v39 = vld [vmem:[#allocation4 + $0x18] sm:$0xff]  ;;  %s749_s28 = scalar_lea.hbm %s1465_s7, %s964_s27  ;;  %s1131_s19 = scalar_lea.hbm %s1465_s7, 64 }
  0x35   : > { %v352_v24 = vrot.slane %v349_v21, 3  ;;  %v378_v26 = vrot.slane %v349_v21, 2  ;;  %531 = vmatpush.bf16.msra.mxu3 %v981_v29  ;;  %v985_v40 = vld [vmem:[#allocation4 + $0x90] sm:$0xff]  ;;  %v984_v43 = vld [vmem:[#allocation4 + $0x88] sm:$0xff]  ;;  %v983_v46 = vld [vmem:[#allocation4 + $0x80] sm:$0xff]  ;;  %s752_s11 = sshll.u32 %s749_s28, 4  ;;  %s753_s11 = int_to_ptr.hbm [resolvable:$true] %s752_s11 }
  0x36   : > { %v345_v17 = vunpack.c.l.b16 %v336_v11  ;;  %677 = vmatpush.bf16.msrb.mxu1 %v990_v13  ;;  %863 = vmatmul.msk.bf16.vlgmr.msra.gmra.mxu2 %vm354_vm2, %v402_v22  ;;  %v977_v41 = vld [vmem:[#allocation4 + $0x50] sm:$0xff]  ;;  %v976_v44 = vld [vmem:[#allocation4 + $0x48] sm:$0xff]  ;;  %v975_v48 = vld [vmem:[#allocation4 + $0x40] sm:$0xff]  ;;  %s1125_s17 = sshra.s32 %s753_s11, 4  ;;  %s1126_s17 = int_to_ptr.hbm [resolvable:$true] %s1125_s17 }
  0x37   : > { %v969_v42 = vld [vmem:[#allocation4 + $0x10] sm:$0xff]  ;;  %v968_v45 = vld [vmem:[#allocation4 + $0x8] sm:$0xff]  ;;  %v967_v49 = vld [vmem:[#allocation4] sm:$0xff]  ;;  %s1127_s20 = scalar_lea.hbm %s1126_s17, 16  ;;  %p1132_p9 = scmp.lt.s32.totalorder %s1126_s17, %s1465_s7 }
  0x38   : > { %v348_v20 = vpack.c.b16 %v346_v16, %v345_v17  ;;  %597 = vmatpush.bf16.msrb.mxu0 %v973_v30  ;;  %v702_v47 = vld [vmem:[%s1463_s5] sm:$0x3]  ;;  %v433_v62 = vld [vmem:[#allocation3] sm:$0xff]  ;;  %p1128_p5 = scmp.ne.s32.totalorder %s1126_s17, %s1127_s20  ;;  %p1133_p10 = scmp.lt.s32.totalorder %s1131_s19, %s1127_s20 }
  0x39   : > { %532 = vmatpush.bf16.msra.mxu3 %v980_v32  ;;  %v711_v50 = vsel %vm358_vm1, %v702_v47, 0  ;;  %v1078_v55 = vld [vmem:[%s1460_s2] ss:$0 sm:$0xff]  ;;  %v434_v1 = vpack.c.bf16 %v433_v62, %v433_v62 }
  0x3a   : > { %v351_v23 = vrot.slane %v348_v20, 3  ;;  %v377_v25 = vrot.slane %v348_v20, 2  ;;  %678 = vmatpush.bf16.msrb.mxu1 %v989_v19  ;;  %720 = vmatpush.bf16.msrb.mxu2 %v711_v50  ;;  %v1079_v22 = vld [vmem:[%s1464_s6] ss:$0 sm:$0xff]  ;;  %p1129_p6 = pnand %p1128_p5, %p1309_p3  ;;  %p1134_p11 = por %p1133_p10, %p1132_p9 }
  0x3b   : > { %v473_v5 = vunpack.c.l.b16 %v434_v1 }
  0x3c   : > { %v353_v27 = vsel %vm350_vm3, %v351_v23, %v352_v24  ;;  %v379_v28 = vsel %vm376_vm4, %v377_v25, %v378_v26  ;;  %598 = vmatpush.bf16.msrb.mxu0 %v972_v33  ;;  %v1080_v24 = vld [vmem:[%s1462_s4] ss:$0 sm:$0xff]  ;;  %p1130_p7 = pneg %p1129_p6 }
  0x3d   : > { %860 = vmatmul.msk.bf16.vlgmr.msra.gmra.mxu0 %vm354_vm2, %v353_v27  ;;  %861 = vmatmul.msk.bf16.vlgmr.msra.gmra.mxu1 %vm354_vm2, %v379_v28 }
  0x3e   : > { %679 = vmatpush.bf16.msrb.mxu1 %v988_v31  ;;  %533 = vmatpush.bf16.msra.mxu3 %v979_v35  ;;  %p1135_p12 = pnand %p1134_p11, %p1130_p7 }
  0x40   : > { %599 = vmatpush.bf16.msrb.mxu0 %v971_v36 }
  0x42   : > { %680 = vmatpush.bf16.msrb.mxu1 %v987_v34  ;;  %534 = vmatpush.bf16.msra.mxu3 %v978_v38 }
  0x44   : > { %600 = vmatpush.bf16.msrb.mxu0 %v970_v39 }
  0x46   : > { %681 = vmatpush.bf16.msrb.mxu1 %v986_v37  ;;  %535 = vmatpush.bf16.msra.mxu3 %v977_v41 }
  0x47   : > { %960 = vmatmul.msk.bf16.vlgmr.msrb.gmra.mxu2 %vm354_vm2, %v701_v51 }
  0x48   : > { %601 = vmatpush.bf16.msrb.mxu0 %v969_v42 }
  0x4a   : > { %682 = vmatpush.bf16.msrb.mxu1 %v985_v40  ;;  %536 = vmatpush.bf16.msra.mxu3 %v976_v44 }
  0x4c   : > { %602 = vmatpush.bf16.msrb.mxu0 %v968_v45 }
  0x4e   : > { %683 = vmatpush.bf16.msrb.mxu1 %v984_v43  ;;  %537 = vmatpush.bf16.msra.mxu3 %v975_v48 }
  0x50   : > { %603 = vmatpush.bf16.msrb.mxu0 %v967_v49 }
  0x52   : > { %684 = vmatpush.bf16.msrb.mxu1 %v983_v46 }
  0xb9   : > { %v418_v56 = vpop.f32.mrf.mxu2 }
  0xba   : > { %v371_v52 = vpop.f32.mrf.mxu0  ;;  %v395_v53 = vpop.f32.mrf.mxu1 }
  0xbb   : > { %v396_v54 = vadd.f32 %v395_v53, %v371_v52 }
  0xbd   : > { %v423_v57 = vadd.f32 %v418_v56, %v396_v54 }
  0xbf   : > { %v429_v58 = vadd.f32 %v1078_v55, %v423_v57 }
  0xc1   : > { %v431_v59 = vmax.f32 %v429_v58, 0.0  ;;  %v420_v0 = vpop.f32.mrf.mxu2 }
  0xc2   : > { %v373_v60 = vpop.f32.mrf.mxu0  ;;  %v397_v61 = vpop.f32.mrf.mxu1 }
  0xc3   : > { %v398_v63 = vadd.f32 %v397_v61, %v373_v60  ;;  %v435_v2 = vpack.c.bf16 %v431_v59, %v431_v59 }
  0xc5   : > { %v424_v3 = vadd.f32 %v420_v0, %v398_v63  ;;  %v474_v6 = vunpack.c.l.b16 %v435_v2 }
  0xc7   : > { %v430_v4 = vadd.f32 %v1078_v55, %v424_v3  ;;  %v476_v9 = vpack.c.b16 %v474_v6, %v473_v5 }
  0xc9   : > { %v432_v7 = vmax.f32 %v430_v4, 0.0  ;;  %v478_v13 = vrot.slane %v476_v9, 3  ;;  %v544_v15 = vrot.slane %v476_v9, 2 }
  0xca   : > { %v722_v25 = vpop.f32.mrf.mxu2 }
  0xcb   : > { %v436_v8 = vpack.c.bf16 %v432_v7, %v432_v7  ;;  %734 = vst [vmem:[#allocation3] sm:$0xff] %v432_v7  ;;  %v723_v27 = vadd.f32 %v1079_v22, %v722_v25 }
  0xcd   : > { %v475_v10 = vunpack.c.l.b16 %v436_v8 }
  0xcf   : > { %v627_v11 = vpack.c.b16 %v475_v10, %v474_v6  ;;  %v477_v12 = vpack.c.b16 %v475_v10, %v475_v10 }
  0xd1   : > { %685 = vmatmul.bf16.vlgmr.msrb.gmra.mxu1 %v627_v11  ;;  %v479_v14 = vrot.slane %v477_v12, 3  ;;  %v545_v16 = vrot.slane %v477_v12, 2 }
  0xd2   : > { %v724_v37 = vpop.f32.mrf.mxu2 }
  0xd3   : > { %v480_v17 = vsel %vm350_vm3, %v478_v13, %v479_v14  ;;  %v546_v18 = vsel %vm376_vm4, %v544_v15, %v545_v16  ;;  %v725_v39 = vadd.f32 %v1079_v22, %v724_v37 }
  0xd4   : > { %538 = vmatmul.bf16.vlgmr.msra.gmra.mxu3 %v480_v17  ;;  %604 = vmatmul.bf16.vlgmr.msrb.gmra.mxu0 %v546_v18 }
 0x14e   : > { %v686_v20 = vpop.f32.mrf.mxu1 }
 0x151   : > { %v605_v19 = vpop.f32.mrf.mxu0 }
 0x156   : > { %v688_v34 = vpop.f32.mrf.mxu1 }
 0x157   : > { %v539_v21 = vpop.f32.mrf.mxu3 }
 0x158   : > { %v606_v23 = vadd.f32 %v605_v19, %v539_v21 }
 0x159   : > { %v607_v30 = vpop.f32.mrf.mxu0 }
 0x15a   : > { %v691_v26 = vadd.f32 %v686_v20, %v606_v23 }
 0x15c   : > { %v697_v28 = vadd.f32 %v1080_v24, %v691_v26 }
 0x15e   : > { %v699_v29 = vmax.f32 %v697_v28, 0.0 }
 0x15f   : > { %v541_v31 = vpop.f32.mrf.mxu3 }
 0x160   : > { %v727_v32 = vadd.f32 %v723_v27, %v699_v29  ;;  %v608_v33 = vadd.f32 %v607_v30, %v541_v31 }
 0x162   : > { %v729_v35 = vmax.f32 %v727_v32, 0.0  ;;  %v692_v36 = vadd.f32 %v688_v34, %v608_v33 }
 0x164   : > { %731 = vst [vmem:[%s1362_s12] sm:$0xff] %v729_v35  ;;  %v698_v38 = vadd.f32 %v1080_v24, %v692_v36 }
 0x166   : > { %v700_v40 = vmax.f32 %v698_v38, 0.0 }
 0x168   : > { %v728_v41 = vadd.f32 %v725_v39, %v700_v40 }
 0x16a   : > { %v730_v42 = vmax.f32 %v728_v41, 0.0 }
 0x16c   : > { %732 = vst [vmem:[%s1362_s12 + $0x8] sm:$0xff] %v730_v42 }
 0x16d   : > { %1138 = shalt.err (!%p1135_p12)
}
 0x16e   : > { %s1215_s12 = smov 128   ;;  %s1216_s22 = smov 8  }
 0x16f   : > { %995 = dma.vmem_to_hbm [thread:$0]  (%p1309_p3), %s751_s21, 256, %s753_s11, %s736_s14, %s1215_s12, %s1215_s12, %s1216_s22  }
 0x170 PF: > { %p1007_p13 = scmp.ge.s32.totalorder %s1209_s8, 2  ;;  %s767_s3 = sand.u32 1, %s1181_s24  }
 0x171   : > { %s768_s28 = scalar_lea.sflag [#allocation6], %s767_s3 }
 0x172   : > { %p1002_p0 = pnand %p1007_p13, %p1318_p8 }
 0x174   : > { %p1003_p1 = pneg %p1002_p0 }
 0x176   : > { %1176 = dma.done.wait (%p1003_p1), %s768_s28, 256  }
 0x177   : > { %1178 = vsyncadd (%p1003_p1), %s768_s28, 4294967040  ;;  %s21_s8 = sadd.s32 1, %s1209_s8   ;;  %s1478_s15 = sld [smem:[#allocation10_spill]] }
 0x178   : > { %p18_p2 = scmp.ge.s32.totalorder %s21_s8, 6   ;;  %s1479_s21 = sld [smem:[#allocation11_spill]] }
 0x179   : > { %s1480_s24 = smov %s1185_s25  ;;  %s1481_s25 = smov %s1189_s26 }
 0x17a   : > { %s1482_s26 = smov %s1339_s10  ;;  %s1483_s27 = smov %s1201_s29 }
 0x17b   : > { %s1484_s28 = smov %s1205_s30  ;;  %20 = sbr.rel (!%p18_p2) target bundleno = 8 (0x8), region = 96 }
 0x17d   : > { %s1485_s29 = smov %s1478_s15 }
 0x17e   : > { %s1486_s30 = smov %s1479_s21 }
 0x180   :  { %774 = vsyncpa [#allocation5], 1 }
 0x181   :  { %776 = vsyncpa [#allocation5 + $0x1], 1 }
 0x182   :  { %777 = vsyncpa [#allocation6], 1 }
 0x183   :  { %779 = vsyncpa [#allocation6 + $0x1], 1 }

</bundles_post_ra>
